<compile_context>
chip_gen: v7x
topology: tpu7x:2x2x1
jax: 0.10.0
libtpu: 0.0.40
codegen_flags: <defaults>
</compile_context>

<pallas_src>
import functools

import jax
import jax.numpy as jnp
from jax.experimental import pallas as pl
from jax.experimental.pallas import tpu as pltpu


_GEMM_DTYPE = jnp.float32   # TODO(synk): jnp.bfloat16 on v6e/v7x (see header).
_BN_EPS = 1e-3


# ------------------------------- small helpers ------------------------------ #

def _rup128(c):
    return ((c + 127) // 128) * 128


def _row_tile(m):
    """Largest multiple-of-8 divisor of m that still yields a >= 2-step grid
    (pipelining everywhere, megacore sharding on v7x), capped at 2048 rows."""
    best = m
    t = 8
    while t <= min(m // 2, 2048):
        if m % t == 0:
            best = t
        t += 8
    return best


def _pad_hw(x, pad_val=None):
    """Spatial pad of 1 on H and W.  pad_val is a per-channel value (None -> 0)."""
    if pad_val is None:
        return jnp.pad(x, ((0, 0), (1, 1), (1, 1), (0, 0)))
    p = pad_val.reshape(1, 1, 1, -1)
    return jnp.pad(x - p, ((0, 0), (1, 1), (1, 1), (0, 0))) + p


def _im2col_3x3(xpad, stride, Ho, Wo, Kp):
    """(N, H+2, W+2, C) padded input -> (N, Ho*Wo, Kp) im2col slab, K = 9*C."""
    N, _, _, C = xpad.shape
    cols = []
    for kh in range(3):
        for kw in range(3):
            cols.append(xpad[:, kh:kh + (Ho - 1) * stride + 1:stride,
                                kw:kw + (Wo - 1) * stride + 1:stride, :])
    s = jnp.concatenate(cols, axis=-1).reshape(N, Ho * Wo, 9 * C)
    return jnp.pad(s, ((0, 0), (0, 0), (0, Kp - 9 * C)))


def _pack_w3x3(w, Kp, Cp):
    Co, Ci = w.shape[0], w.shape[1]
    wc = jnp.transpose(w, (2, 3, 1, 0)).reshape(9 * Ci, Co)   # (kh,kw,ci) -> K
    return jnp.pad(wc, ((0, Kp - 9 * Ci), (0, Cp - Co)))


def _pack_w1x1(w, Kp, Cp):
    Co, Ci = w.shape[0], w.shape[1]
    wc = jnp.transpose(w[:, :, 0, 0], (1, 0))
    return jnp.pad(wc, ((0, Kp - Ci), (0, Cp - Co)))


def _bn_affine(stats, gamma, beta, m_total, eps=_BN_EPS):
    """Reduce per-image partial stats -> per-channel BN scale/shift (real channels).
    Note: E[x^2] - mean^2 in f32 — fine at 1e-3 tolerance here; switch to a centered
    two-pass accumulation if |mean| >> std ever holds for this net."""
    tot = jnp.sum(stats, axis=0)                    # (2, Cp)
    c = gamma.shape[0]
    mean = tot[0, :c] / m_total
    var = jnp.maximum(tot[1, :c] / m_total - mean * mean, 0.0)
    scale = gamma * jax.lax.rsqrt(var + eps)
    shift = beta - mean * scale
    return scale, shift


def _bn_zero_pad_value(scale, shift):
    """Per-channel value p with prelu(p*scale + shift) == 0, i.e. padding the raw
    activation with p is exactly zero-padding the BN+PReLU output.  (scale == 0
    only if gamma == 0; then 0 is the safe choice.)"""
    safe = jnp.where(scale != 0, scale, 1.0)
    return jnp.where(scale != 0, -shift / safe, 0.0)


def _act_kvecs(scale, shift, taps, Kp):
    """Tile per-channel BN scale/shift across the conv taps along K, zero-pad to Kp."""
    sk = jnp.tile(scale, taps)
    hk = jnp.tile(shift, taps)
    pad = Kp - sk.shape[0]
    return (jnp.pad(sk, (0, pad)).reshape(1, Kp),
            jnp.pad(hk, (0, pad)).reshape(1, Kp))


# ----------------------- conv: single GEMM per image ------------------------ #

def _conv_gemm_kernel(x_ref, w_ref, sc_ref, sh_ref, a_ref, y_ref, st_ref, *,
                      apply_act):
    """One image: im2col-slab GEMM with a fused prologue activation and fused
    per-image BN statistics.

    x_ref:  (1, HW, Kp)  im2col slab of image n (K = taps*Cin_real, zero padded)
    w_ref:  (Kp, Cp)     folded weight matrix
    sc_ref: (1, Kp)      previous layer's BN scale per K column (0 in K padding)
    sh_ref: (1, Kp)      previous layer's BN shift per K column (0 in K padding)
    a_ref:  (1, 1) SMEM  previous layer's PReLU alpha
    y_ref:  (1, HW, Cp)  raw conv output rows of image n (lane dense)
    st_ref: (1, 2, Cp)   per-image [sum; sum-of-squares] of the raw conv output
    """
    x = x_ref[0]
    if apply_act:
        # Previous layer's BatchNorm + PReLU, applied while the slab is in VMEM.
        # Spatial-border entries were pre-padded with -shift/scale, so they map
        # exactly to 0 (== zero padding of the activated tensor).
        x = x * sc_ref[...] + sh_ref[...]
        alpha = a_ref[0, 0]
        x = jnp.where(x > 0, x, alpha * x)
    y = jnp.dot(x.astype(_GEMM_DTYPE), w_ref[...].astype(_GEMM_DTYPE),
                preferred_element_type=jnp.float32)
    y_ref[0] = y                                      # single store of the block
    s = jnp.sum(y, axis=0, keepdims=True)             # stats from the live value,
    q = jnp.sum(y * y, axis=0, keepdims=True)         # not a y_ref re-read
    st_ref[0] = jnp.concatenate([s, q], axis=0)


def _conv_call(cols, w_col, sc_k, sh_k, alpha, apply_act):
    N, HW, Kp = cols.shape
    Cp = w_col.shape[1]
    kernel = functools.partial(_conv_gemm_kernel, apply_act=apply_act)
    return pl.pallas_call(
        kernel,
        out_shape=(jax.ShapeDtypeStruct((N, HW, Cp), jnp.float32),
                   jax.ShapeDtypeStruct((N, 2, Cp), jnp.float32)),
        grid=(N,),
        in_specs=[
            pl.BlockSpec((1, HW, Kp), lambda n: (n, 0, 0)),
            pl.BlockSpec((Kp, Cp), lambda n: (0, 0)),
            pl.BlockSpec((1, Kp), lambda n: (0, 0)),
            pl.BlockSpec((1, Kp), lambda n: (0, 0)),
            pl.BlockSpec(memory_space=pltpu.MemorySpace.SMEM),
        ],
        out_specs=(
            pl.BlockSpec((1, HW, Cp), lambda n: (n, 0, 0)),
            pl.BlockSpec((1, 2, Cp), lambda n: (n, 0, 0)),
        ),
        # Per-image partial stats -> no carried accumulation -> batch axis parallel.
        compiler_params=pltpu.CompilerParams(
            dimension_semantics=("parallel",)),
    )(cols, w_col, sc_k, sh_k, jnp.reshape(alpha, (1, 1)).astype(jnp.float32))


# ------------ fused tail: BN3 (+ identity BN) + residual add + PReLU --------- #

def _tail_proj_kernel(y3_ref, yi_ref, s3_ref, h3_ref, si_ref, hi_ref, a_ref,
                      o_ref, *, n_real):
    r = y3_ref[...] * s3_ref[...] + h3_ref[...]          # BN3
    idn = yi_ref[...] * si_ref[...] + hi_ref[...]        # BN of the 1x1 projection
    v = r + idn
    alpha = a_ref[0, 0]
    v = jnp.where(v > 0, v, alpha * v)                   # output PReLU
    o_ref[...] = v[:, :n_real]                           # drop channel padding


def _tail_proj(y3, yi, s3, h3, si, hi, alpha, n_real):
    M, Cp = y3.shape
    tm = _row_tile(M)
    kernel = functools.partial(_tail_proj_kernel, n_real=n_real)
    return pl.pallas_call(
        kernel,
        out_shape=jax.ShapeDtypeStruct((M, n_real), jnp.float32),
        grid=(M // tm,),
        in_specs=[
            pl.BlockSpec((tm, Cp), lambda i: (i, 0)),
            pl.BlockSpec((tm, Cp), lambda i: (i, 0)),
            pl.BlockSpec((1, Cp), lambda i: (0, 0)),
            pl.BlockSpec((1, Cp), lambda i: (0, 0)),
            pl.BlockSpec((1, Cp), lambda i: (0, 0)),
            pl.BlockSpec((1, Cp), lambda i: (0, 0)),
            pl.BlockSpec(memory_space=pltpu.MemorySpace.SMEM),
        ],
        out_specs=pl.BlockSpec((tm, n_real), lambda i: (i, 0)),
        compiler_params=pltpu.CompilerParams(
            dimension_semantics=("parallel",)),
    )(y3, yi, s3, h3, si, hi, jnp.reshape(alpha, (1, 1)).astype(jnp.float32))


def _tail_identity_kernel(y3_ref, x_ref, s3_ref, h3_ref, a_ref, o_ref, *, n_real):
    r = (y3_ref[...] * s3_ref[...] + h3_ref[...])[:, :n_real]   # BN3, real channels
    v = r + x_ref[...]                                          # + raw identity
    alpha = a_ref[0, 0]
    o_ref[...] = jnp.where(v > 0, v, alpha * v)


def _tail_identity(y3, x2d, s3, h3, alpha, n_real):
    M, Cp = y3.shape
    tm = _row_tile(M)
    kernel = functools.partial(_tail_identity_kernel, n_real=n_real)
    return pl.pallas_call(
        kernel,
        out_shape=jax.ShapeDtypeStruct((M, n_real), jnp.float32),
        grid=(M // tm,),
        in_specs=[
            pl.BlockSpec((tm, Cp), lambda i: (i, 0)),
            pl.BlockSpec((tm, n_real), lambda i: (i, 0)),   # un-padded identity input
            pl.BlockSpec((1, Cp), lambda i: (0, 0)),
            pl.BlockSpec((1, Cp), lambda i: (0, 0)),
            pl.BlockSpec(memory_space=pltpu.MemorySpace.SMEM),
        ],
        out_specs=pl.BlockSpec((tm, n_real), lambda i: (i, 0)),
        compiler_params=pltpu.CompilerParams(
            dimension_semantics=("parallel",)),
    )(y3, x2d, s3, h3, jnp.reshape(alpha, (1, 1)).astype(jnp.float32))


# ----------------------------- resBlock forward ------------------------------ #

def init_resblock_params(key, iChannels, oChannels, stride):
    n = oChannels
    c4, c2 = n // 4, n // 2
    ks = jax.random.split(key, 8)

    def conv_w(k, cout, cin, kh, kw):
        fan_in = cin * kh * kw
        return (jax.random.normal(k, (cout, cin, kh, kw), jnp.float32)
                * (1.0 / jnp.sqrt(fan_in)))

    # Conv biases are kept (used by the pure-JAX reference) but the Pallas path
    # drops them: every conv is followed by a training-mode BatchNorm, which
    # cancels a per-channel constant exactly.
    p = {
        "w1": conv_w(ks[0], c4, iChannels, 3, 3),
        "b1": 0.01 * jax.random.normal(ks[1], (c4,), jnp.float32),
        "g1": jnp.ones((c4,), jnp.float32), "be1": jnp.zeros((c4,), jnp.float32),
        "a1": jnp.asarray(0.25, jnp.float32),
        "w2": conv_w(ks[2], c2, c4, 3, 3),
        "b2": 0.01 * jax.random.normal(ks[3], (c2,), jnp.float32),
        "g2": jnp.ones((c2,), jnp.float32), "be2": jnp.zeros((c2,), jnp.float32),
        "a2": jnp.asarray(0.25, jnp.float32),
        "w3": conv_w(ks[4], n, c2, 3, 3),
        "b3": 0.01 * jax.random.normal(ks[5], (n,), jnp.float32),
        "g3": jnp.ones((n,), jnp.float32), "be3": jnp.zeros((n,), jnp.float32),
        "a_out": jnp.asarray(0.25, jnp.float32),
    }
    if stride > 1 or iChannels != n:
        p["wi"] = conv_w(ks[6], n, iChannels, 1, 1)
        p["bi"] = 0.01 * jax.random.normal(ks[7], (n,), jnp.float32)
        p["gi"] = jnp.ones((n,), jnp.float32)
        p["bei"] = jnp.zeros((n,), jnp.float32)
    return p


def resblock_forward(params, x_nchw, stride):
    x = jnp.transpose(x_nchw, (0, 2, 3, 1)).astype(jnp.float32)       # NHWC
    N, H, W, Ci = x.shape
    w1, w2, w3 = params["w1"], params["w2"], params["w3"]
    c4, c2, n_out = w1.shape[0], w2.shape[0], w3.shape[0]

    # ---- conv1 (3x3, stride 1): raw input, no fused prologue ----
    Kp1, Cp1 = _rup128(9 * Ci), _rup128(c4)
    cols1 = _im2col_3x3(_pad_hw(x), 1, H, W, Kp1)
    y1, st1 = _conv_call(cols1, _pack_w3x3(w1, Kp1, Cp1),
                         jnp.zeros((1, Kp1), jnp.float32),
                         jnp.zeros((1, Kp1), jnp.float32),
                         jnp.zeros((), jnp.float32), apply_act=False)

    # ---- conv2 (3x3, stride s), BN1 + PReLU1 fused into its prologue ----
    sc1, sh1 = _bn_affine(st1, params["g1"], params["be1"], N * H * W)
    y1_img = y1[:, :, :c4].reshape(N, H, W, c4)
    H2 = (H - 1) // stride + 1
    W2 = (W - 1) // stride + 1
    Kp2, Cp2 = _rup128(9 * c4), _rup128(c2)
    cols2 = _im2col_3x3(_pad_hw(y1_img, _bn_zero_pad_value(sc1, sh1)),
                        stride, H2, W2, Kp2)
    sk1, hk1 = _act_kvecs(sc1, sh1, 9, Kp2)
    y2, st2 = _conv_call(cols2, _pack_w3x3(w2, Kp2, Cp2), sk1, hk1,
                         params["a1"], apply_act=True)

    # ---- conv3 (3x3, stride 1), BN2 + PReLU2 fused into its prologue ----
    M2 = N * H2 * W2
    sc2, sh2 = _bn_affine(st2, params["g2"], params["be2"], M2)
    y2_img = y2[:, :, :c2].reshape(N, H2, W2, c2)
    Kp3, Cp3 = _rup128(9 * c2), _rup128(n_out)
    cols3 = _im2col_3x3(_pad_hw(y2_img, _bn_zero_pad_value(sc2, sh2)),
                        1, H2, W2, Kp3)
    sk2, hk2 = _act_kvecs(sc2, sh2, 9, Kp3)
    y3, st3 = _conv_call(cols3, _pack_w3x3(w3, Kp3, Cp3), sk2, hk2,
                         params["a2"], apply_act=True)

    M3 = N * H2 * W2
    sc3, sh3 = _bn_affine(st3, params["g3"], params["be3"], M3)
    y3_2d = y3.reshape(M3, Cp3)
    s3v = jnp.zeros((1, Cp3), jnp.float32).at[0, :n_out].set(sc3)
    h3v = jnp.zeros((1, Cp3), jnp.float32).at[0, :n_out].set(sh3)

    # ---- identity branch + fused tail (BN3 [+ BNi] + add + PReLU) ----
    if "wi" in params:
        Kpi = _rup128(Ci)
        xs = x[:, ::stride, ::stride, :][:, :H2, :W2, :]
        colsi = jnp.pad(xs.reshape(N, H2 * W2, Ci),
                        ((0, 0), (0, 0), (0, Kpi - Ci)))
        yi, sti = _conv_call(colsi, _pack_w1x1(params["wi"], Kpi, Cp3),
                             jnp.zeros((1, Kpi), jnp.float32),
                             jnp.zeros((1, Kpi), jnp.float32),
                             jnp.zeros((), jnp.float32), apply_act=False)
        sci, shi = _bn_affine(sti, params["gi"], params["bei"], M3)
        siv = jnp.zeros((1, Cp3), jnp.float32).at[0, :n_out].set(sci)
        hiv = jnp.zeros((1, Cp3), jnp.float32).at[0, :n_out].set(shi)
        out2d = _tail_proj(y3_2d, yi.reshape(M3, Cp3), s3v, h3v, siv, hiv,
                           params["a_out"], n_out)
    else:
        assert stride == 1 and Ci == n_out
        out2d = _tail_identity(y3_2d, x.reshape(M3, Ci), s3v, h3v,
                               params["a_out"], n_out)

    out = out2d.reshape(N, H2, W2, n_out)
    return jnp.transpose(out, (0, 3, 1, 2))              # back to NCHW


# ------------------------------ pure-JAX reference --------------------------- #

def _ref_forward(params, x_nchw, stride):
    def conv(x, w, b, s, pad):
        y = jax.lax.conv_general_dilated(
            x, w, (s, s), [(pad, pad), (pad, pad)],
            dimension_numbers=("NCHW", "OIHW", "NCHW"))
        return y + b[None, :, None, None]

    def bn(x, g, be):
        mean = jnp.mean(x, axis=(0, 2, 3), keepdims=True)
        var = jnp.mean((x - mean) ** 2, axis=(0, 2, 3), keepdims=True)
        return ((x - mean) * jax.lax.rsqrt(var + _BN_EPS)
                * g[None, :, None, None] + be[None, :, None, None])

    def prelu(x, a):
        return jnp.where(x > 0, x, a * x)

    r = conv(x_nchw, params["w1"], params["b1"], 1, 1)
    r = prelu(bn(r, params["g1"], params["be1"]), params["a1"])
    r = conv(r, params["w2"], params["b2"], stride, 1)
    r = prelu(bn(r, params["g2"], params["be2"]), params["a2"])
    r = conv(r, params["w3"], params["b3"], 1, 1)
    r = bn(r, params["g3"], params["be3"])
    if "wi" in params:
        idt = bn(conv(x_nchw, params["wi"], params["bi"], stride, 0),
                 params["gi"], params["bei"])
    else:
        idt = x_nchw
    return prelu(r + idt, params["a_out"])


# ---------------------------------- main ------------------------------------- #

if __name__ == "__main__":
    key = jax.random.PRNGKey(0)

    # Config 1: projection shortcut (stride=2, channel change).
    k_x, k_p, k_x2, k_p2 = jax.random.split(key, 4)
    x = jax.random.normal(k_x, (2, 4, 16, 16), jnp.float32)
    params = init_resblock_params(k_p, iChannels=4, oChannels=16, stride=2)
    out = resblock_forward(params, x, stride=2)
    out = jax.block_until_ready(out)
    ref = _ref_forward(params, x, 2)
    assert out.shape == (2, 16, 8, 8), out.shape
    assert jnp.allclose(out, ref, atol=1e-3, rtol=1e-3), \
        float(jnp.max(jnp.abs(out - ref)))

    # Config 2: plain identity shortcut (stride=1, same channels).
    x2 = jax.random.normal(k_x2, (2, 8, 16, 16), jnp.float32)
    params2 = init_resblock_params(k_p2, iChannels=8, oChannels=8, stride=1)
    out2 = resblock_forward(params2, x2, stride=1)
    out2 = jax.block_until_ready(out2)
    ref2 = _ref_forward(params2, x2, 1)
    assert out2.shape == (2, 8, 16, 16), out2.shape
    assert jnp.allclose(out2, ref2, atol=1e-3, rtol=1e-3), \
        float(jnp.max(jnp.abs(out2 - ref2)))

    print("KERNEL_OK")
</pallas_src>

<mosaic_0001>
module attributes {stable_mosaic.version = 11 : i64} {
  func.func @_conv_gemm_kernel(%arg0: i32, %arg1: memref<1x256x128xf32, #tpu.memory_space<vmem>>, %arg2: memref<128x128xf32, #tpu.memory_space<vmem>>, %arg3: memref<1x128xf32, #tpu.memory_space<vmem>>, %arg4: memref<1x128xf32, #tpu.memory_space<vmem>>, %arg5: memref<1x1xf32, #tpu.memory_space<smem>>, %arg6: memref<1x256x128xf32, #tpu.memory_space<vmem>>, %arg7: memref<1x2x128xf32, #tpu.memory_space<vmem>>) attributes {dimension_semantics = [#tpu.dimension_semantics<parallel>], iteration_bounds = array<i64: 2>, scalar_prefetch = 0 : i64, scratch_operands = 0 : i64, tpu.core_type = #tpu.core_type<tc>, window_params = [{transform_indices = @transform_0, window_bounds = array<i64: 1, 256, 128>}, {pipeline_mode = #tpu.pipeline_mode<synchronous>, transform_indices = @transform_1, window_bounds = array<i64: 128, 128>}, {pipeline_mode = #tpu.pipeline_mode<synchronous>, transform_indices = @transform_2, window_bounds = array<i64: 1, 128>}, {pipeline_mode = #tpu.pipeline_mode<synchronous>, transform_indices = @transform_3, window_bounds = array<i64: 1, 128>}, {transform_indices = @transform_4, window_bounds = array<i64: 1, 1>}, {transform_indices = @transform_5, window_bounds = array<i64: 1, 256, 128>}, {transform_indices = @transform_6, window_bounds = array<i64: 1, 2, 128>}]} {
    %c0 = arith.constant 0 : index
    %c0_0 = arith.constant 0 : index
    %c0_1 = arith.constant 0 : index
    %0 = vector.load %arg1[%c0, %c0_0, %c0_1] : memref<1x256x128xf32, #tpu.memory_space<vmem>>, vector<1x256x128xf32>
    %1 = vector.shape_cast %0 : vector<1x256x128xf32> to vector<256x128xf32>
    %c0_2 = arith.constant 0 : index
    %c0_3 = arith.constant 0 : index
    %2 = vector.load %arg2[%c0_2, %c0_3] : memref<128x128xf32, #tpu.memory_space<vmem>>, vector<128x128xf32>
    %cst = arith.constant dense<0.000000e+00> : vector<256x128xf32>
    %3 = tpu.matmul %1, %2, %cst {dimension_numbers = #tpu.dot_dimension_numbers<[1], [0], [0], [1], [0, 0, 1, 1], [], []>} : vector<256x128xf32>, vector<128x128xf32>, vector<256x128xf32> -> vector<256x128xf32>
    %c0_4 = arith.constant 0 : index
    %c0_5 = arith.constant 0 : index
    %c0_6 = arith.constant 0 : index
    %4 = vector.load %arg6[%c0_4, %c0_5, %c0_6] : memref<1x256x128xf32, #tpu.memory_space<vmem>>, vector<1x256x128xf32>
    %5 = vector.shape_cast %4 : vector<1x256x128xf32> to vector<256x128xf32>
    %6 = vector.shape_cast %3 : vector<256x128xf32> to vector<1x256x128xf32>
    tpu.vector_store %arg6[%c0_4, %c0_5, %c0_6], %6 {strides = array<i32>} : memref<1x256x128xf32, #tpu.memory_space<vmem>>, vector<1x256x128xf32>,
    %cst_7 = arith.constant dense<0.000000e+00> : vector<128xf32>
    %7 = vector.multi_reduction <add>, %3, %cst_7 [0] : vector<256x128xf32> to vector<128xf32>
    %8 = vector.shape_cast %7 : vector<128xf32> to vector<1x128xf32>
    %9 = arith.mulf %3, %3 : vector<256x128xf32>
    %cst_8 = arith.constant dense<0.000000e+00> : vector<128xf32>
    %10 = vector.multi_reduction <add>, %9, %cst_8 [0] : vector<256x128xf32> to vector<128xf32>
    %11 = vector.shape_cast %10 : vector<128xf32> to vector<1x128xf32>
    %12 = tpu.concatenate %8, %11 in 0 : vector<1x128xf32>, vector<1x128xf32> -> vector<2x128xf32>
    %c0_9 = arith.constant 0 : index
    %c0_10 = arith.constant 0 : index
    %c0_11 = arith.constant 0 : index
    %13 = vector.load %arg7[%c0_9, %c0_10, %c0_11] : memref<1x2x128xf32, #tpu.memory_space<vmem>>, vector<1x2x128xf32>
    %14 = vector.shape_cast %13 : vector<1x2x128xf32> to vector<2x128xf32>
    %15 = vector.shape_cast %12 : vector<2x128xf32> to vector<1x2x128xf32>
    tpu.vector_store %arg7[%c0_9, %c0_10, %c0_11], %15 {strides = array<i32>} : memref<1x2x128xf32, #tpu.memory_space<vmem>>, vector<1x2x128xf32>,
    return
  }
  func.func @transform_0(%arg0: i32) -> (i32, i32, i32) {
    %c0_i32 = arith.constant 0 : i32
    %c0_i32_0 = arith.constant 0 : i32
    %c0_i32_1 = arith.constant 0 : i32
    return %arg0, %c0_i32, %c0_i32_0 : i32, i32, i32
  }
  func.func @transform_1(%arg0: i32) -> (i32, i32) {
    %c0_i32 = arith.constant 0 : i32
    %c0_i32_0 = arith.constant 0 : i32
    %c0_i32_1 = arith.constant 0 : i32
    return %c0_i32, %c0_i32_0 : i32, i32
  }
  func.func @transform_2(%arg0: i32) -> (i32, i32) {
    %c0_i32 = arith.constant 0 : i32
    %c0_i32_0 = arith.constant 0 : i32
    %c0_i32_1 = arith.constant 0 : i32
    return %c0_i32, %c0_i32_0 : i32, i32
  }
  func.func @transform_3(%arg0: i32) -> (i32, i32) {
    %c0_i32 = arith.constant 0 : i32
    %c0_i32_0 = arith.constant 0 : i32
    %c0_i32_1 = arith.constant 0 : i32
    return %c0_i32, %c0_i32_0 : i32, i32
  }
  func.func @transform_4(%arg0: i32) -> (i32, i32) {
    %c0_i32 = arith.constant 0 : i32
    %c0_i32_0 = arith.constant 0 : i32
    %c0_i32_1 = arith.constant 0 : i32
    return %c0_i32, %c0_i32_0 : i32, i32
  }
  func.func @transform_5(%arg0: i32) -> (i32, i32, i32) {
    %c0_i32 = arith.constant 0 : i32
    %c0_i32_0 = arith.constant 0 : i32
    %c0_i32_1 = arith.constant 0 : i32
    return %arg0, %c0_i32, %c0_i32_0 : i32, i32, i32
  }
  func.func @transform_6(%arg0: i32) -> (i32, i32, i32) {
    %c0_i32 = arith.constant 0 : i32
    %c0_i32_0 = arith.constant 0 : i32
    %c0_i32_1 = arith.constant 0 : i32
    return %arg0, %c0_i32, %c0_i32_0 : i32, i32, i32
  }
}

</mosaic_0001>

<bundles_post_ra>
// kernel: tpu_custom_call.1
= control target key start
LH: loop header
LB: loop body
LE: loop exit
PB: predicated region body
PF: predicated region fallthrough
CT: control target
= control target key end

     0   :  { %13 = vsyncpa [#allocation4], 0  ;;  %s1733_s0 = inlined_call_operand.hbm [shape: f32[2,256,128], index: 0, kind: input, shape index: {}]   ;;  %s1734_s1 = inlined_call_operand.hbm [shape: f32[128,128], index: 1, kind: input, shape index: {}]   ;;  %s1735_s2 = inlined_call_operand.vmem [shape: f32[1,128], index: 2, kind: input, shape index: {}]   ;;  %s1736_s3 = inlined_call_operand.vmem [shape: f32[1,128], index: 3, kind: input, shape index: {}]   ;;  %s1737_s4 = inlined_call_operand.<no memory space> [shape: f32[1,1], index: 4, kind: input, shape index: {}]   ;;  %s1738_s5 = inlined_call_operand.hbm [shape: f32[2,256,128], index: 5, kind: output, shape index: {0}]   ;;  %s1739_s6 = inlined_call_operand.hbm [shape: f32[2,2,128], index: 6, kind: output, shape index: {1}]  }
   0x1   :  { %15 = vsyncpa [#allocation4 + $0x1], 0 }
   0x2   :  { %16 = vsyncpa [#allocation7], 0 }
   0x3   :  { %17 = vsyncpa [#allocation5], 0 }
   0x4   :  { %19 = vsyncpa [#allocation5 + $0x1], 0 }
   0x5   :  { %20 = vsyncpa [#allocation10], 0 }
   0x6   :  { %22 = vsyncpa [#allocation10 + $0x1], 0  ;;  %s1326_s2 = smov 0   ;;  %s1328_s21 = smov 0  }
   0x7   :  { %s1330_s3 = smov 0   ;;  %s1332_s4 = smov 0  }
   0x8 LB: > { %s1347_s22 = sadd.s32 4294967295, %s1281_s4   ;;  %s858_s23 = sadd.s32 4294967294, %s1281_s4   ;;  %s1281_s4 = sphi %s1332_s4, %s1759_s4   ;;  %s1277_s3 = sphi %s1330_s3, %s1758_s3   ;;  %s1273_s21 = sphi %s1328_s21, %s1757_s21   ;;  %s1269_s2 = sphi %s1326_s2, %s1756_s2  }
   0x9   : > { %p48_p0 = scmp.ne.s32.totalorder %s1273_s21, %s1269_s2  ;;  %p1740_p1 = scmp.eq.s32.totalorder %s1347_s22, 0 }
   0xa   : > { %p162_p3 = scmp.eq.s32.totalorder %s858_s23, 1  ;;  %p859_p5 = scmp.ge.s32.totalorder %s1281_s4, 1 }
   0xb   : > { %p1356_p4 = por %p1740_p1, %p48_p0  ;;  %p195_p7 = scmp.lt.s32.totalorder %s1281_s4, 3 }
   0xc   : > { %p1361_p6 = por %p162_p3, %p48_p0  ;;  %s1283_s27 = smov [#allocation6]  }
   0xd   : > { %s1743_s24 = scalar_select %p1356_p4, 1, 0 }
   0xe   : > { %s1744_s25 = scalar_select %p1361_p6, 1, 0 }
   0xf   : > { %p1366_p8 = pnand %p859_p5, %p195_p7  ;;  %s207_s28 = sshll.u32 %s1283_s27, 4  ;;  %s1370_s28 = int_to_ptr.vmem [resolvable:$true] %s207_s28 }
  0x10   : > { %s1382_s30 = sadd.s32 1, %s1281_s4   ;;  %s35_s7 = sadd.s32 1, %s1277_s3 }
  0x11   : > { %s1745_s26 = scalar_select %p1366_p8, 1, 0 }
  0x12   : > { %p1065_p9 = pneg %p1366_p8  ;;  %s32_s8 = ssub.s32 %s1281_s4, %s1382_s30 }
  0x13   : > { %s1121_s11 = scalar_lea.hbm %s1734_s1, 2048 }
  0x14   : > { %p1377_p11 = pnand %p1065_p9, %p1740_p1  ;;  %p1122_p12 = scmp.ne.s32.totalorder %s1734_s1, %s1121_s11 }
  0x15   : > { %p1128_p5 = scmp.lt.u32.totalorder %s1121_s11, %s1734_s1 }
  0x16   : > { %p1123_p13 = pneg %p1377_p11 }
  0x18   : > { %p1124_p0 = pnand %p1123_p13, %p1122_p12 }
  0x1a   : > { %p1125_p3 = pneg %p1124_p0 }
  0x1c   : > { %p1130_p7 = pnand %p1128_p5, %p1125_p3 }
  0x1e   : > { %1133 = shalt.err (!%p1130_p7)
}
  0x1f   : > { %s1134_s16 = scalar_lea.vmem %s1370_s28, 2048  ;;  %p1142_p2 = scmp.lt.s32.totalorder %s1370_s28, %s1370_s28 }
  0x20   : > { %p1135_p9 = scmp.ne.s32.totalorder %s1370_s28, %s1134_s16  ;;  %p1143_p6 = scmp.lt.s32.totalorder %s1134_s16, %s1134_s16 }
  0x22   : > { %p1137_p10 = pnand %p1135_p9, %p1123_p13  ;;  %p1144_p4 = por %p1143_p6, %p1142_p2 }
  0x24   : > { %p1138_p1 = pneg %p1137_p10 }
  0x26   : > { %p1145_p8 = pnand %p1144_p4, %p1138_p1 }
  0x28   : > { %1148 = shalt.err (!%p1145_p8)
}
  0x29   : > { %s1284_s17 = smov 128   ;;  %s1285_s18 = smov 8  }
  0x2a   : > { %1068 = dma.hbm_to_vmem [thread:$0]  (!%p1377_p11), %s1734_s1, 2048, %s1370_s28, [#allocation7], %s1284_s17, %s1284_s17, %s1285_s18  }
  0x2b   : > { %p33_p1 = scmp.eq.s32.totalorder %s32_s8, 0  ;;  %p42_p2 = scmp.ne.s32.totalorder %s1277_s3, %s1273_s21 }
  0x2c   : > { %p43_p4 = scmp.eq.s32.totalorder %s1281_s4, 0  ;;  %p1081_p6 = scmp.lt.s32.totalorder %s1281_s4, 2 }
  0x2d   : > { %s1416_s23 = scalar_select %p33_p1, %s1277_s3, %s35_s7  }
  0x2e   : > { %p44_p8 = por %p43_p4, %p42_p2  ;;  %p1747_p10 = scmp.eq.s32.totalorder %s1347_s22, 1 }
  0x2f   : > { %s230_s29 = sand.u32 1, %s1277_s3   ;;  %s877_s9 = sshll.u32 %s1281_s4, 12 }
  0x30   : > { %p1420_p12 = por %p1747_p10, %p42_p2  ;;  %s862_s10 = sshll.u32 %s230_s29, 8 }
  0x31   : > { %s1429_s13 = scalar_lea.hbm %s1733_s0, %s877_s9  ;;  %s234_s28 = scalar_lea.vmem [#allocation3], %s862_s10 }
  0x32   : > { %s241_s7 = sshll.u32 %s234_s28, 4  ;;  %p1431_p11 = pnand %p1081_p6, %p44_p8  ;;  %s1435_s7 = int_to_ptr.vmem [resolvable:$true] %s241_s7 }
  0x33   : > { %s1437_s14 = scalar_lea.sflag [#allocation4], %s230_s29  ;;  %s1149_s15 = scalar_lea.hbm %s1429_s13, 4096 }
  0x34   : > { %p1150_p13 = scmp.ne.s32.totalorder %s1429_s13, %s1149_s15  ;;  %p1151_p0 = pneg %p1431_p11 }
  0x35   : > { %s1154_s20 = scalar_lea.hbm %s1733_s0, 8192  ;;  %p1155_p7 = scmp.lt.u32.totalorder %s1429_s13, %s1733_s0 }
  0x36   : > { %p1152_p3 = pnand %p1151_p0, %p1150_p13  ;;  %p1156_p9 = scmp.lt.u32.totalorder %s1154_s20, %s1149_s15 }
  0x37   : > { %p1158_p2 = scmp.lt.u32.totalorder %s1149_s15, %s1429_s13 }
  0x38   : > { %p1153_p5 = pneg %p1152_p3  ;;  %p1157_p1 = por %p1156_p9, %p1155_p7 }
  0x3a   : > { %p1159_p4 = por %p1158_p2, %p1157_p1 }
  0x3c   : > { %p1160_p6 = pnand %p1159_p4, %p1153_p5 }
  0x3e   : > { %1163 = shalt.err (!%p1160_p6)
}
  0x3f   : > { %s1164_s29 = scalar_lea.vmem %s1435_s7, 4096  ;;  %s1286_s11 = smov [#allocation3]  }
  0x40   : > { %p1165_p8 = scmp.ne.s32.totalorder %s1435_s7, %s1164_s29  ;;  %s1169_s12 = sshll.u32 %s1286_s11, 4  ;;  %s1170_s12 = int_to_ptr.vmem [resolvable:$false] %s1169_s12 }
  0x41   : > { %s1171_s28 = scalar_lea.vmem %s1170_s12, 8192  ;;  %p1172_p3 = scmp.lt.s32.totalorder %s1435_s7, %s1170_s12 }
  0x42   : > { %p1167_p10 = pnand %p1165_p8, %p1151_p0  ;;  %p1173_p7 = scmp.lt.s32.totalorder %s1171_s28, %s1164_s29 }
  0x44   : > { %p1168_p13 = pneg %p1167_p10  ;;  %p1174_p9 = por %p1173_p7, %p1172_p3 }
  0x46   : > { %p1175_p1 = pnand %p1174_p9, %p1168_p13 }
  0x48   : > { %1178 = shalt.err (!%p1175_p1)
}
  0x49   : > { %1072 = dma.hbm_to_vmem [thread:$0]  (!%p1431_p11), %s1429_s13, 4096, %s1435_s7, %s1437_s14, %s1284_s17, %s1284_s17, %s1285_s18  }
  0x4a   : > { %p1750_p0 = scmp.ne.s32.totalorder %s1745_s26, 0 }
  0x4b   : > { %s1471_s15 = sand.u32 (!%p1750_p0), 1, %s1273_s21   ;;  %p1751_p5 = scmp.ne.s32.totalorder (!%p1750_p0), %s1743_s24, 0 }
  0x4c   : > { %253 = sbr.rel (%p1750_p0) target bundleno = 439 (0x1b7), region = 40  ;;  %s866_s16 = sshll.u32 (!%p1750_p0), %s1471_s15, 8 }
  0x4d   : > { %s256_s19 = scalar_lea.sflag (!%p1750_p0), [#allocation4], %s1471_s15  ;;  %s1477_s8 = scalar_lea.vmem (!%p1750_p0), [#allocation3], %s866_s16 }
  0x53   : > { %1252 = dma.done.wait (%p1751_p5), %s256_s19, 4096  }
  0x54   : > { %1254 = vsyncadd (%p1751_p5), %s256_s19, 4294963200  ;;  %p1752_p11 = scmp.eq.s32.totalorder %s1347_s22, 0 }
  0x56   : > { %1256 = dma.done.wait (%p1752_p11), [#allocation7], 2048   ;;  %p1753_p2 = pmov %p1752_p11 }
  0x57   : > { %v329_v0 = vld [vmem:[#allocation6] sm:$0xff]  ;;  %v330_v1 = vld [vmem:[#allocation6 + $0x8] sm:$0xff]  ;;  %v331_v2 = vld [vmem:[#allocation6 + $0x10] sm:$0xff]  ;;  %s1523_s24 = scalar_lea.vmem [#allocation8], %s866_s16  ;;  %s878_s26 = sshll.u32 %s1347_s22, 12 }
  0x58   : > { %1258 = vsyncadd (%p1753_p2), [#allocation7], 4294965248  ;;  %v1007_v3 = vpack.c.bf16 %v330_v1, %v329_v0  ;;  %v332_v4 = vld [vmem:[#allocation6 + $0x18] sm:$0xff]  ;;  %v333_v6 = vld [vmem:[#allocation6 + $0x20] sm:$0xff]  ;;  %s730_s17 = sshll.u32 %s1523_s24, 4  ;;  %s1598_s7 = scalar_lea.hbm %s1738_s5, %s878_s26  ;;  %s1600_s17 = int_to_ptr.vmem [resolvable:$true] %s730_s17 }
  0x59   : > { %v1011_v5 = vpack.c.bf16 %v332_v4, %v331_v2  ;;  %v334_v7 = vld [vmem:[#allocation6 + $0x28] sm:$0xff]  ;;  %v297_v9 = vld [vmem:[%s1477_s8] sm:$0xff]  ;;  %v335_v10 = vld [vmem:[#allocation6 + $0x30] sm:$0xff]  ;;  %s712_s14 = scalar_lea.sflag [#allocation5], %s1471_s15  ;;  %s1179_s20 = scalar_lea.vmem %s1600_s17, 4096 }
  0x5a   : > { %1008 = vmatprep.subr.bf16.mxu0 %v1007_v3  ;;  %1039 = vmatprep.subr.bf16.mxu1 %v1007_v3  ;;  %v1015_v8 = vpack.c.bf16 %v334_v7, %v333_v6  ;;  %v336_v11 = vld [vmem:[#allocation6 + $0x38] sm:$0xff]  ;;  %v337_v13 = vld [vmem:[#allocation6 + $0x40] sm:$0xff]  ;;  %v338_v14 = vld [vmem:[#allocation6 + $0x48] sm:$0xff]  ;;  %p1180_p4 = scmp.ne.s32.totalorder %s1600_s17, %s1179_s20  ;;  %s1287_s9 = smov [#allocation8]  }
  0x5b   : > { %1010 = vmatpush3.bf16.msra.mxu0 %v1007_v3  ;;  %1047 = vmatpush3.bf16.msra.mxu1 %v1007_v3  ;;  %v1019_v12 = vpack.c.bf16 %v336_v11, %v335_v10  ;;  %v313_v15 = vld [vmem:[%s1477_s8 + $0x80] sm:$0xff]  ;;  %v1023_v16 = vpack.c.bf16 %v338_v14, %v337_v13  ;;  %v339_v17 = vld [vmem:[#allocation6 + $0x50] sm:$0xff]  ;;  %v340_v18 = vld [vmem:[#allocation6 + $0x58] sm:$0xff]  ;;  %s1183_s10 = sshll.u32 %s1287_s9, 4  ;;  %s1184_s10 = int_to_ptr.vmem [resolvable:$false] %s1183_s10 }
  0x5c   : > { %1012 = vmatprep.subr.bf16.mxu0 %v1011_v5  ;;  %1040 = vmatprep.subr.bf16.mxu1 %v1011_v5  ;;  %v1027_v19 = vpack.c.bf16 %v340_v18, %v339_v17  ;;  %v341_v20 = vld [vmem:[#allocation6 + $0x60] sm:$0xff]  ;;  %v342_v21 = vld [vmem:[#allocation6 + $0x68] sm:$0xff]  ;;  %v343_v23 = vld [vmem:[#allocation6 + $0x70] sm:$0xff]  ;;  %p1181_p6 = pnand %p1180_p4, %p1420_p12  ;;  %s1185_s29 = scalar_lea.vmem %s1184_s10, 8192 }
  0x5d   : > { %959 = vmatprep.mubr.f32.mxu0 %v297_v9  ;;  %983 = vmatprep.mubr.f32.mxu1 %v313_v15  ;;  %v1031_v22 = vpack.c.bf16 %v342_v21, %v341_v20  ;;  %v344_v24 = vld [vmem:[#allocation6 + $0x78] sm:$0xff]  ;;  %v298_v26 = vld [vmem:[%s1477_s8 + $0x8] sm:$0xff]  ;;  %v299_v28 = vld [vmem:[%s1477_s8 + $0x10] sm:$0xff]  ;;  %p1186_p10 = scmp.lt.s32.totalorder %s1600_s17, %s1184_s10  ;;  %p1187_p13 = scmp.lt.s32.totalorder %s1185_s29, %s1179_s20 }
  0x5e   : > { %v1035_v25 = vpack.c.bf16 %v344_v24, %v343_v23  ;;  %v314_v27 = vld [vmem:[%s1477_s8 + $0x88] sm:$0xff]  ;;  %v315_v29 = vld [vmem:[%s1477_s8 + $0x90] sm:$0xff]  ;;  %v300_v30 = vld [vmem:[%s1477_s8 + $0x18] sm:$0xff]  ;;  %p1182_p8 = pneg %p1181_p6 }
  0x5f   : > { %1014 = vmatpush3.bf16.msra.mxu0 %v1011_v5  ;;  %1048 = vmatpush3.bf16.msra.mxu1 %v1011_v5  ;;  %v316_v31 = vld [vmem:[%s1477_s8 + $0x98] sm:$0xff]  ;;  %v301_v32 = vld [vmem:[%s1477_s8 + $0x20] sm:$0xff]  ;;  %v302_v34 = vld [vmem:[%s1477_s8 + $0x28] sm:$0xff]  ;;  %p1188_p3 = por %p1187_p13, %p1186_p10 }
  0x60   : > { %1016 = vmatprep.subr.bf16.mxu0 %v1015_v8  ;;  %1041 = vmatprep.subr.bf16.mxu1 %v1015_v8  ;;  %v317_v33 = vld [vmem:[%s1477_s8 + $0xa0] sm:$0xff]  ;;  %v318_v35 = vld [vmem:[%s1477_s8 + $0xa8] sm:$0xff]  ;;  %v303_v36 = vld [vmem:[%s1477_s8 + $0x30] sm:$0xff] }
  0x61   : > { %v319_v37 = vld [vmem:[%s1477_s8 + $0xb0] sm:$0xff]  ;;  %v304_v38 = vld [vmem:[%s1477_s8 + $0x38] sm:$0xff]  ;;  %v305_v40 = vld [vmem:[%s1477_s8 + $0x40] sm:$0xff]  ;;  %p1189_p7 = pnand %p1188_p3, %p1182_p8 }
  0x62   : > { %v320_v39 = vld [vmem:[%s1477_s8 + $0xb8] sm:$0xff]  ;;  %v321_v41 = vld [vmem:[%s1477_s8 + $0xc0] sm:$0xff]  ;;  %v306_v42 = vld [vmem:[%s1477_s8 + $0x48] sm:$0xff] }
  0x63   : > { %1018 = vmatpush3.bf16.msra.mxu0 %v1015_v8  ;;  %1049 = vmatpush3.bf16.msra.mxu1 %v1015_v8  ;;  %v322_v43 = vld [vmem:[%s1477_s8 + $0xc8] sm:$0xff]  ;;  %v307_v44 = vld [vmem:[%s1477_s8 + $0x50] sm:$0xff]  ;;  %v308_v46 = vld [vmem:[%s1477_s8 + $0x58] sm:$0xff] }
  0x64   : > { %1020 = vmatprep.subr.bf16.mxu0 %v1019_v12  ;;  %1042 = vmatprep.subr.bf16.mxu1 %v1019_v12  ;;  %v323_v45 = vld [vmem:[%s1477_s8 + $0xd0] sm:$0xff]  ;;  %v324_v47 = vld [vmem:[%s1477_s8 + $0xd8] sm:$0xff]  ;;  %v309_v48 = vld [vmem:[%s1477_s8 + $0x60] sm:$0xff] }
  0x65   : > { %v325_v49 = vld [vmem:[%s1477_s8 + $0xe0] sm:$0xff]  ;;  %v310_v50 = vld [vmem:[%s1477_s8 + $0x68] sm:$0xff]  ;;  %v311_v52 = vld [vmem:[%s1477_s8 + $0x70] sm:$0xff] }
  0x66   : > { %v326_v51 = vld [vmem:[%s1477_s8 + $0xe8] sm:$0xff]  ;;  %v327_v53 = vld [vmem:[%s1477_s8 + $0xf0] sm:$0xff]  ;;  %v312_v54 = vld [vmem:[%s1477_s8 + $0x78] sm:$0xff] }
  0x67   : > { %1022 = vmatpush3.bf16.msra.mxu0 %v1019_v12  ;;  %1050 = vmatpush3.bf16.msra.mxu1 %v1019_v12  ;;  %v328_v55 = vld [vmem:[%s1477_s8 + $0xf8] sm:$0xff] }
  0x68   : > { %1024 = vmatprep.subr.bf16.mxu0 %v1023_v16  ;;  %1043 = vmatprep.subr.bf16.mxu1 %v1023_v16 }
  0x6b   : > { %1026 = vmatpush3.bf16.msra.mxu0 %v1023_v16  ;;  %1051 = vmatpush3.bf16.msra.mxu1 %v1023_v16 }
  0x6c   : > { %1028 = vmatprep.subr.bf16.mxu0 %v1027_v19  ;;  %1044 = vmatprep.subr.bf16.mxu1 %v1027_v19 }
  0x6f   : > { %1030 = vmatpush3.bf16.msra.mxu0 %v1027_v19  ;;  %1052 = vmatpush3.bf16.msra.mxu1 %v1027_v19 }
  0x70   : > { %1032 = vmatprep.subr.bf16.mxu0 %v1031_v22  ;;  %1045 = vmatprep.subr.bf16.mxu1 %v1031_v22 }
  0x73   : > { %1034 = vmatpush3.bf16.msra.mxu0 %v1031_v22  ;;  %1053 = vmatpush3.bf16.msra.mxu1 %v1031_v22 }
  0x74   : > { %1036 = vmatprep.subr.bf16.mxu0 %v1035_v25  ;;  %1046 = vmatprep.subr.bf16.mxu1 %v1035_v25 }
  0x77   : > { %1038 = vmatpush3.bf16.msra.mxu0 %v1035_v25  ;;  %1054 = vmatpush3.bf16.msra.mxu1 %v1035_v25 }
  0x7a   : > { %960 = vmatmul.mubr.f32.vlgmr.msra.gmra.mrb[0].mxu0 %v298_v26  ;;  %984 = vmatmul.mubr.f32.vlgmr.msra.gmra.mrb[0].mxu1 %v314_v27 }
  0x7b   : > { %962 = vmatprep.mubr.f32.mxu0 %v299_v28  ;;  %986 = vmatprep.mubr.f32.mxu1 %v315_v29 }
  0x7e   : > { %963 = vmatmul.mubr.f32.gmra.mrb[2].mxu0 %v300_v30  ;;  %987 = vmatmul.mubr.f32.gmra.mrb[2].mxu1 %v316_v31 }
  0x7f   : > { %965 = vmatprep.mubr.f32.mxu0 %v301_v32  ;;  %989 = vmatprep.mubr.f32.mxu1 %v317_v33 }
  0x82   : > { %966 = vmatmul.mubr.f32.gmra.mrb[4].mxu0 %v302_v34  ;;  %990 = vmatmul.mubr.f32.gmra.mrb[4].mxu1 %v318_v35 }
  0x83   : > { %968 = vmatprep.mubr.f32.mxu0 %v303_v36  ;;  %992 = vmatprep.mubr.f32.mxu1 %v319_v37 }
  0x86   : > { %969 = vmatmul.mubr.f32.gmra.mrb[6].mxu0 %v304_v38  ;;  %993 = vmatmul.mubr.f32.gmra.mrb[6].mxu1 %v320_v39 }
  0x87   : > { %971 = vmatprep.mubr.f32.mxu0 %v305_v40  ;;  %995 = vmatprep.mubr.f32.mxu1 %v321_v41 }
  0x8a   : > { %972 = vmatmul.mubr.f32.gmra.mrb[8].mxu0 %v306_v42  ;;  %996 = vmatmul.mubr.f32.gmra.mrb[8].mxu1 %v322_v43 }
  0x8b   : > { %974 = vmatprep.mubr.f32.mxu0 %v307_v44  ;;  %998 = vmatprep.mubr.f32.mxu1 %v323_v45 }
  0x8e   : > { %975 = vmatmul.mubr.f32.gmra.mrb[10].mxu0 %v308_v46  ;;  %999 = vmatmul.mubr.f32.gmra.mrb[10].mxu1 %v324_v47 }
  0x8f   : > { %977 = vmatprep.mubr.f32.mxu0 %v309_v48  ;;  %1001 = vmatprep.mubr.f32.mxu1 %v325_v49 }
  0x92   : > { %978 = vmatmul.mubr.f32.gmra.mrb[12].mxu0 %v310_v50  ;;  %1002 = vmatmul.mubr.f32.gmra.mrb[12].mxu1 %v326_v51 }
  0x93   : > { %980 = vmatprep.mubr.f32.mxu0 %v311_v52  ;;  %1004 = vmatprep.mubr.f32.mxu1 %v327_v53 }
  0x96   : > { %981 = vmatmul.mubr.f32.gmra.mrb[14].mxu0 %v312_v54  ;;  %1005 = vmatmul.mubr.f32.gmra.mrb[14].mxu1 %v328_v55 }
 0x14d   : > { %v961_v56 = vpop.f32.mrb[0].mxu0  ;;  %v1519_v57 = vpop.f32.mrb[0].mxu1 }
 0x14e   : > { %571 = vst [vmem:[%s1523_s24 + $0x8] sm:$0xff] %v961_v56  ;;  %v640_v58 = vmul.f32 %v961_v56, %v961_v56  ;;  %v411_v59 = vpop.f32.mrb[1].mxu0  ;;  %587 = vst [vmem:[%s1523_s24 + $0x88] sm:$0xff] %v1519_v57  ;;  %v1528_v60 = vpop.f32.mrb[1].mxu1 }
 0x14f   : > { %570 = vst [vmem:[%s1523_s24] sm:$0xff] %v411_v59  ;;  %v602_v61 = vadd.f32 %v961_v56, %v411_v59  ;;  %v639_v62 = vmul.f32 %v411_v59, %v411_v59  ;;  %586 = vst [vmem:[%s1523_s24 + $0x80] sm:$0xff] %v1528_v60 }
 0x151   : > { %v671_v63 = vadd.f32 %v640_v58, %v639_v62  ;;  %v964_v0 = vpop.f32.mrb[2].mxu0  ;;  %v1533_v1 = vpop.f32.mrb[2].mxu1 }
 0x152   : > { %573 = vst [vmem:[%s1523_s24 + $0x18] sm:$0xff] %v964_v0  ;;  %v421_v2 = vpop.f32.mrb[3].mxu0  ;;  %589 = vst [vmem:[%s1523_s24 + $0x98] sm:$0xff] %v1533_v1  ;;  %v1538_v3 = vpop.f32.mrb[3].mxu1  ;;  %v642_v6 = vmul.f32 %v964_v0, %v964_v0 }
 0x153   : > { %572 = vst [vmem:[%s1523_s24 + $0x10] sm:$0xff] %v421_v2  ;;  %v603_v4 = vadd.f32 %v602_v61, %v421_v2  ;;  %v641_v5 = vmul.f32 %v421_v2, %v421_v2  ;;  %588 = vst [vmem:[%s1523_s24 + $0x90] sm:$0xff] %v1538_v3 }
 0x155   : > { %v672_v7 = vadd.f32 %v671_v63, %v641_v5  ;;  %v967_v8 = vpop.f32.mrb[4].mxu0  ;;  %v604_v9 = vadd.f32 %v964_v0, %v603_v4  ;;  %v1543_v10 = vpop.f32.mrb[4].mxu1 }
 0x156   : > { %575 = vst [vmem:[%s1523_s24 + $0x28] sm:$0xff] %v967_v8  ;;  %v431_v11 = vpop.f32.mrb[5].mxu0  ;;  %591 = vst [vmem:[%s1523_s24 + $0xa8] sm:$0xff] %v1543_v10  ;;  %v1548_v12 = vpop.f32.mrb[5].mxu1  ;;  %v644_v16 = vmul.f32 %v967_v8, %v967_v8 }
 0x157   : > { %574 = vst [vmem:[%s1523_s24 + $0x20] sm:$0xff] %v431_v11  ;;  %v605_v13 = vadd.f32 %v604_v9, %v431_v11  ;;  %v643_v14 = vmul.f32 %v431_v11, %v431_v11  ;;  %v673_v15 = vadd.f32 %v672_v7, %v642_v6  ;;  %590 = vst [vmem:[%s1523_s24 + $0xa0] sm:$0xff] %v1548_v12 }
 0x159   : > { %v674_v17 = vadd.f32 %v673_v15, %v643_v14  ;;  %v970_v18 = vpop.f32.mrb[6].mxu0  ;;  %v606_v19 = vadd.f32 %v967_v8, %v605_v13  ;;  %v1553_v20 = vpop.f32.mrb[6].mxu1 }
 0x15a   : > { %577 = vst [vmem:[%s1523_s24 + $0x38] sm:$0xff] %v970_v18  ;;  %v441_v21 = vpop.f32.mrb[7].mxu0  ;;  %593 = vst [vmem:[%s1523_s24 + $0xb8] sm:$0xff] %v1553_v20  ;;  %v1558_v22 = vpop.f32.mrb[7].mxu1  ;;  %v646_v26 = vmul.f32 %v970_v18, %v970_v18 }
 0x15b   : > { %576 = vst [vmem:[%s1523_s24 + $0x30] sm:$0xff] %v441_v21  ;;  %v607_v23 = vadd.f32 %v606_v19, %v441_v21  ;;  %v645_v24 = vmul.f32 %v441_v21, %v441_v21  ;;  %v675_v25 = vadd.f32 %v674_v17, %v644_v16  ;;  %592 = vst [vmem:[%s1523_s24 + $0xb0] sm:$0xff] %v1558_v22 }
 0x15d   : > { %v676_v27 = vadd.f32 %v675_v25, %v645_v24  ;;  %v973_v28 = vpop.f32.mrb[8].mxu0  ;;  %v608_v29 = vadd.f32 %v970_v18, %v607_v23  ;;  %v1563_v30 = vpop.f32.mrb[8].mxu1 }
 0x15e   : > { %579 = vst [vmem:[%s1523_s24 + $0x48] sm:$0xff] %v973_v28  ;;  %v451_v31 = vpop.f32.mrb[9].mxu0  ;;  %595 = vst [vmem:[%s1523_s24 + $0xc8] sm:$0xff] %v1563_v30  ;;  %v1568_v32 = vpop.f32.mrb[9].mxu1  ;;  %v648_v36 = vmul.f32 %v973_v28, %v973_v28 }
 0x15f   : > { %578 = vst [vmem:[%s1523_s24 + $0x40] sm:$0xff] %v451_v31  ;;  %v609_v33 = vadd.f32 %v608_v29, %v451_v31  ;;  %v647_v34 = vmul.f32 %v451_v31, %v451_v31  ;;  %v677_v35 = vadd.f32 %v676_v27, %v646_v26  ;;  %594 = vst [vmem:[%s1523_s24 + $0xc0] sm:$0xff] %v1568_v32 }
 0x161   : > { %v678_v37 = vadd.f32 %v677_v35, %v647_v34  ;;  %v976_v38 = vpop.f32.mrb[10].mxu0  ;;  %v610_v39 = vadd.f32 %v973_v28, %v609_v33  ;;  %v1573_v40 = vpop.f32.mrb[10].mxu1 }
 0x162   : > { %581 = vst [vmem:[%s1523_s24 + $0x58] sm:$0xff] %v976_v38  ;;  %v461_v41 = vpop.f32.mrb[11].mxu0  ;;  %597 = vst [vmem:[%s1523_s24 + $0xd8] sm:$0xff] %v1573_v40  ;;  %v1578_v42 = vpop.f32.mrb[11].mxu1  ;;  %v650_v46 = vmul.f32 %v976_v38, %v976_v38 }
 0x163   : > { %580 = vst [vmem:[%s1523_s24 + $0x50] sm:$0xff] %v461_v41  ;;  %v611_v43 = vadd.f32 %v610_v39, %v461_v41  ;;  %v649_v44 = vmul.f32 %v461_v41, %v461_v41  ;;  %v679_v45 = vadd.f32 %v678_v37, %v648_v36  ;;  %596 = vst [vmem:[%s1523_s24 + $0xd0] sm:$0xff] %v1578_v42 }
 0x165   : > { %v680_v47 = vadd.f32 %v679_v45, %v649_v44  ;;  %v979_v48 = vpop.f32.mrb[12].mxu0  ;;  %v612_v49 = vadd.f32 %v976_v38, %v611_v43  ;;  %v1583_v50 = vpop.f32.mrb[12].mxu1 }
 0x166   : > { %583 = vst [vmem:[%s1523_s24 + $0x68] sm:$0xff] %v979_v48  ;;  %v471_v51 = vpop.f32.mrb[13].mxu0  ;;  %599 = vst [vmem:[%s1523_s24 + $0xe8] sm:$0xff] %v1583_v50  ;;  %v1590_v52 = vpop.f32.mrb[13].mxu1  ;;  %v652_v56 = vmul.f32 %v979_v48, %v979_v48 }
 0x167   : > { %582 = vst [vmem:[%s1523_s24 + $0x60] sm:$0xff] %v471_v51  ;;  %v613_v53 = vadd.f32 %v612_v49, %v471_v51  ;;  %v651_v54 = vmul.f32 %v471_v51, %v471_v51  ;;  %v681_v55 = vadd.f32 %v680_v47, %v650_v46  ;;  %598 = vst [vmem:[%s1523_s24 + $0xe0] sm:$0xff] %v1590_v52 }
 0x169   : > { %v682_v58 = vadd.f32 %v681_v55, %v651_v54  ;;  %v982_v59 = vpop.f32.mrb[14].mxu0  ;;  %v614_v61 = vadd.f32 %v979_v48, %v613_v53  ;;  %v1602_v62 = vpop.f32.mrb[14].mxu1 }
 0x16a   : > { %585 = vst [vmem:[%s1523_s24 + $0x78] sm:$0xff] %v982_v59  ;;  %v481_v63 = vpop.f32.mrb[15].mxu0  ;;  %601 = vst [vmem:[%s1523_s24 + $0xf8] sm:$0xff] %v1602_v62  ;;  %v1607_v0 = vpop.f32.mrb[15].mxu1 }
 0x16b   : > { %584 = vst [vmem:[%s1523_s24 + $0x70] sm:$0xff] %v481_v63  ;;  %v615_v2 = vadd.f32 %v614_v61, %v481_v63  ;;  %v653_v4 = vmul.f32 %v481_v63, %v481_v63  ;;  %v683_v5 = vadd.f32 %v682_v58, %v652_v56  ;;  %600 = vst [vmem:[%s1523_s24 + $0xf0] sm:$0xff] %v1607_v0 }
 0x16c   : > { %1192 = shalt.err (!%p1189_p7)
}
 0x16d   : > { %s1193_s11 = scalar_lea.hbm %s1598_s7, 4096  ;;  %s1197_s16 = scalar_lea.hbm %s1738_s5, 8192 }
 0x16e   : > { %p1194_p9 = scmp.ne.s32.totalorder %s1598_s7, %s1193_s11  ;;  %p1198_p5 = scmp.lt.u32.totalorder %s1598_s7, %s1738_s5 }
 0x16f   : > { %p1199_p11 = scmp.lt.u32.totalorder %s1197_s16, %s1193_s11  ;;  %p1201_p4 = scmp.lt.u32.totalorder %s1193_s11, %s1598_s7 }
 0x170   : > { %p1195_p1 = pnand %p1194_p9, %p1420_p12 }
 0x171   : > { %p1200_p2 = por %p1199_p11, %p1198_p5 }
 0x172   : > { %p1196_p0 = pneg %p1195_p1 }
 0x173   : > { %p1202_p6 = por %p1201_p4, %p1200_p2 }
 0x175   : > { %p1203_p8 = pnand %p1202_p6, %p1196_p0 }
 0x177   : > { %1206 = shalt.err (!%p1203_p8)
}
 0x178   : > { %s1288_s24 = smov 128   ;;  %s1289_s26 = smov 8   ;;  %v654_v6 = vmul.f32 %v982_v59, %v982_v59  ;;  %v616_v7 = vadd.f32 %v982_v59, %v615_v2  ;;  %v684_v8 = vadd.f32 %v683_v5, %v653_v4  ;;  %v655_v9 = vmul.f32 %v1528_v60, %v1528_v60 }
 0x179   : > { %1061 = dma.vmem_to_hbm [thread:$0]  (%p1420_p12), %s1600_s17, 4096, %s1598_s7, %s712_s14, %s1288_s24, %s1288_s24, %s1289_s26   ;;  %v656_v14 = vmul.f32 %v1519_v57, %v1519_v57  ;;  %v657_v17 = vmul.f32 %v1538_v3, %v1538_v3  ;;  %v658_v21 = vmul.f32 %v1533_v1, %v1533_v1  ;;  %v669_v48 = vmul.f32 %v1607_v0, %v1607_v0 }
 0x17a   : > { %v685_v11 = vadd.f32 %v684_v8, %v654_v6  ;;  %v617_v13 = vadd.f32 %v616_v7, %v1528_v60  ;;  %v659_v60 = vmul.f32 %v1548_v12, %v1548_v12  ;;  %s869_s17 = sshll.u32 %s1471_s15, 1  ;;  %s874_s18 = sshll.u32 %s1347_s22, 5  ;;  %vm708_vm0 = vcmask 1040384  }
 0x17b   : > { %s296_s13 = scalar_lea.vmem [#allocation9], %s869_s17  ;;  %s1689_s9 = scalar_lea.hbm %s1739_s6, %s874_s18 }
 0x17c   : > { %v686_v15 = vadd.f32 %v685_v11, %v655_v9  ;;  %v618_v16 = vadd.f32 %v1519_v57, %v617_v13  ;;  %v660_v57 = vmul.f32 %v1543_v10, %v1543_v10  ;;  %s746_s7 = sshll.u32 %s296_s13, 4  ;;  %s717_s10 = scalar_lea.sflag [#allocation10], %s1471_s15  ;;  %s1691_s7 = int_to_ptr.vmem [resolvable:$true] %s746_s7 }
 0x17d   : > { %s1207_s29 = scalar_lea.vmem %s1691_s7, 32  ;;  %s1290_s22 = smov [#allocation9]  }
 0x17e   : > { %v619_v18 = vadd.f32 %v618_v16, %v1538_v3  ;;  %v687_v19 = vadd.f32 %v686_v15, %v656_v14  ;;  %v661_v3 = vmul.f32 %v1558_v22, %v1558_v22  ;;  %p1208_p10 = scmp.ne.s32.totalorder %s1691_s7, %s1207_s29  ;;  %s1211_s11 = sshll.u32 %s1290_s22, 4  ;;  %s1212_s11 = int_to_ptr.vmem [resolvable:$false] %s1211_s11 }
 0x17f   : > { %s1213_s12 = scalar_lea.vmem %s1212_s11, 64  ;;  %p1214_p7 = scmp.lt.s32.totalorder %s1691_s7, %s1212_s11 }
 0x180   : > { %v688_v23 = vadd.f32 %v687_v19, %v657_v17  ;;  %v620_v24 = vadd.f32 %v1533_v1, %v619_v18  ;;  %v662_v1 = vmul.f32 %v1553_v20, %v1553_v20  ;;  %p1209_p13 = pnand %p1208_p10, %p1420_p12  ;;  %p1215_p9 = scmp.lt.s32.totalorder %s1213_s12, %s1207_s29 }
 0x182   : > { %v621_v25 = vadd.f32 %v620_v24, %v1548_v12  ;;  %v689_v26 = vadd.f32 %v688_v23, %v658_v21  ;;  %v663_v12 = vmul.f32 %v1568_v32, %v1568_v32  ;;  %p1210_p3 = pneg %p1209_p13  ;;  %p1216_p1 = por %p1215_p9, %p1214_p7 }
 0x184   : > { %v690_v27 = vadd.f32 %v689_v26, %v659_v60  ;;  %v622_v28 = vadd.f32 %v1543_v10, %v621_v25  ;;  %v664_v10 = vmul.f32 %v1563_v30, %v1563_v30  ;;  %p1217_p0 = pnand %p1216_p1, %p1210_p3 }
 0x186   : > { %v623_v29 = vadd.f32 %v622_v28, %v1558_v22  ;;  %v691_v31 = vadd.f32 %v690_v27, %v660_v57  ;;  %v665_v22 = vmul.f32 %v1578_v42, %v1578_v42 }
 0x188   : > { %v692_v33 = vadd.f32 %v691_v31, %v661_v3  ;;  %v624_v34 = vadd.f32 %v1553_v20, %v623_v29  ;;  %v666_v20 = vmul.f32 %v1573_v40, %v1573_v40 }
 0x18a   : > { %v625_v35 = vadd.f32 %v624_v34, %v1568_v32  ;;  %v693_v36 = vadd.f32 %v692_v33, %v662_v1  ;;  %v667_v32 = vmul.f32 %v1590_v52, %v1590_v52 }
 0x18c   : > { %v694_v37 = vadd.f32 %v693_v36, %v663_v12  ;;  %v626_v38 = vadd.f32 %v1563_v30, %v625_v35  ;;  %v668_v30 = vmul.f32 %v1583_v50, %v1583_v50 }
 0x18e   : > { %v627_v39 = vadd.f32 %v626_v38, %v1578_v42  ;;  %v695_v41 = vadd.f32 %v694_v37, %v664_v10 }
 0x190   : > { %v696_v43 = vadd.f32 %v695_v41, %v665_v22  ;;  %v628_v44 = vadd.f32 %v1573_v40, %v627_v39  ;;  %v670_v40 = vmul.f32 %v1602_v62, %v1602_v62 }
 0x192   : > { %v629_v45 = vadd.f32 %v628_v44, %v1590_v52  ;;  %v697_v46 = vadd.f32 %v696_v43, %v666_v20 }
 0x194   : > { %v698_v47 = vadd.f32 %v697_v46, %v667_v32  ;;  %v630_v42 = vadd.f32 %v1583_v50, %v629_v45 }
 0x196   : > { %v631_v49 = vadd.f32 %v630_v42, %v1607_v0  ;;  %v699_v51 = vadd.f32 %v698_v47, %v668_v30 }
 0x198   : > { %v632_v52 = vadd.f32 %v1602_v62, %v631_v49  ;;  %v700_v53 = vadd.f32 %v699_v51, %v669_v48 }
 0x19a   : > { %v633_v54 = vrot.slane %v632_v52, 4  ;;  %v701_v55 = vadd.f32 %v700_v53, %v670_v40 }
 0x19c   : > { %v634_v56 = vadd.f32 %v633_v54, %v632_v52  ;;  %v702_v58 = vrot.slane %v701_v55, 4 }
 0x19e   : > { %v635_v59 = vrot.slane %v634_v56, 2  ;;  %v703_v61 = vadd.f32 %v702_v58, %v701_v55 }
 0x1a0   : > { %v636_v50 = vadd.f32 %v635_v59, %v634_v56  ;;  %v704_v63 = vrot.slane %v703_v61, 2 }
 0x1a2   : > { %v637_v2 = vrot.slane %v636_v50, 1  ;;  %v705_v0 = vadd.f32 %v704_v63, %v703_v61 }
 0x1a4   : > { %v706_v4 = vrot.slane %v705_v0, 1  ;;  %v638_v62 = vadd.f32 %v637_v2, %v636_v50 }
 0x1a6   : > { %v707_v5 = vadd.f32 %v706_v4, %v705_v0 }
 0x1a8   : > { %v709_v6 = vsel %vm708_vm0, %v638_v62, %v707_v5 }
 0x1a9   : > { %710 = vst [vmem:[%s296_s13] sm:$0x3] %v709_v6 }
 0x1aa   : > { %1220 = shalt.err (!%p1217_p0)
}
 0x1ab   : > { %s1221_s15 = scalar_lea.hbm %s1689_s9, 32  ;;  %s1225_s19 = scalar_lea.hbm %s1739_s6, 64 }
 0x1ac   : > { %p1222_p5 = scmp.ne.s32.totalorder %s1689_s9, %s1221_s15  ;;  %p1226_p4 = scmp.lt.u32.totalorder %s1689_s9, %s1739_s6 }
 0x1ad   : > { %p1227_p6 = scmp.lt.u32.totalorder %s1225_s19, %s1221_s15  ;;  %p1229_p10 = scmp.lt.u32.totalorder %s1221_s15, %s1689_s9 }
 0x1ae   : > { %p1223_p11 = pnand %p1222_p5, %p1420_p12 }
 0x1af   : > { %p1228_p8 = por %p1227_p6, %p1226_p4 }
 0x1b0   : > { %p1224_p2 = pneg %p1223_p11 }
 0x1b1   : > { %p1230_p13 = por %p1229_p10, %p1228_p8 }
 0x1b3   : > { %p1231_p3 = pnand %p1230_p13, %p1224_p2 }
 0x1b5   : > { %1234 = shalt.err (!%p1231_p3)
}
 0x1b6   : > { %1062 = dma.vmem_to_hbm [thread:$0]  (%p1420_p12), %s1691_s7, 32, %s1689_s9, %s717_s10  }
 0x1b7 PF: > { %s758_s26 = sand.u32 1, %s1269_s2   ;;  %p1754_p7 = scmp.ne.s32.totalorder %s1744_s25, 0 }
 0x1b8   : > { %p1755_p9 = scmp.ge.s32.totalorder %s1281_s4, 2  ;;  %s759_s17 = scalar_lea.sflag [#allocation5], %s758_s26 }
 0x1ba   : > { %p1074_p1 = pnand %p1755_p9, %p1754_p7 }
 0x1bc   : > { %1260 = dma.done.wait (!%p1074_p1), %s759_s17, 4096  }
 0x1bd   : > { %1262 = vsyncadd (!%p1074_p1), %s759_s17, 4294963200  ;;  %s768_s18 = scalar_lea.sflag [#allocation10], %s758_s26 }
 0x1be   : > { %1264 = dma.done.wait (!%p1074_p1), %s768_s18, 32  }
 0x1bf   : > { %1266 = vsyncadd (!%p1074_p1), %s768_s18, 4294967264  ;;  %p25_p12 = scmp.ge.s32.totalorder %s1382_s30, 4   ;;  %s1756_s2 = smov %s1273_s21 }
 0x1c0   : > { %s1757_s21 = smov %s1277_s3  ;;  %s1758_s3 = smov %s1416_s23 }
 0x1c1   : > { %s1759_s4 = smov %s1382_s30  ;;  %27 = sbr.rel (!%p25_p12) target bundleno = 8 (0x8), region = 106 }
 0x1c8   :  { %773 = vsyncpa [#allocation4], 1 }
 0x1c9   :  { %775 = vsyncpa [#allocation4 + $0x1], 1 }
 0x1ca   :  { %776 = vsyncpa [#allocation7], 1 }
 0x1cb   :  { %777 = vsyncpa [#allocation5], 1 }
 0x1cc   :  { %779 = vsyncpa [#allocation5 + $0x1], 1 }
 0x1cd   :  { %780 = vsyncpa [#allocation10], 1 }
 0x1ce   :  { %782 = vsyncpa [#allocation10 + $0x1], 1 }

</bundles_post_ra>
